<compile_context>
chip_gen: v5e
topology: v5e:2x2
jax: 0.10.0
libtpu: 0.0.40
codegen_flags: <defaults>
</compile_context>

<pallas_src>
import jax
import jax.numpy as jnp
from jax.experimental import pallas as pl
from jax.experimental.pallas import tpu as pltpu


# ---------------------------------------------------------------------------
# Kernels (fused, everything resident in VMEM)
# ---------------------------------------------------------------------------
def dqn_hidden_kernel(x_ref, w1_ref, b1_ref, w2_ref, b2_ref, o_ref):
    # h = relu(x @ W1 + b1)   -- bf16 operands, f32 accumulate, f32 bias/relu
    h = jnp.dot(x_ref[...], w1_ref[...], preferred_element_type=jnp.float32)
    h = jnp.maximum(h + b1_ref[...], 0.0)
    # q = h @ W2 + b2         -- feed MXU in bf16 again, accumulate f32
    out = jnp.dot(h.astype(w2_ref.dtype), w2_ref[...],
                  preferred_element_type=jnp.float32)
    o_ref[...] = (out + b2_ref[...]).astype(o_ref.dtype)


def dqn_linear_kernel(x_ref, w_ref, b_ref, o_ref):
    out = jnp.dot(x_ref[...], w_ref[...], preferred_element_type=jnp.float32)
    o_ref[...] = (out + b_ref[...]).astype(o_ref.dtype)


# ---------------------------------------------------------------------------
# Parameter preparation (done ONCE, outside the per-step hot path)
# ---------------------------------------------------------------------------
def _round_up(n, m):
    return ((n + m - 1) // m) * m


def _pad_to(a, shape):
    return jnp.pad(a, [(0, t - s) for s, t in zip(a.shape, shape)])


def prepare_hidden_params(w1, b1, w2, b2, compute_dtype=jnp.bfloat16):
    """Pad the hidden dim to a multiple of 128 (exact: relu(0+0)=0 feeds zero
    rows of W2) and cast weights to bf16.  Biases stay f32.  The action dim is
    NOT padded, so the kernel emits the real-width output directly."""
    S, H = w1.shape
    A = w2.shape[1]
    Hp = _round_up(H, 128)
    w1p = _pad_to(w1, (S, Hp)).astype(compute_dtype)
    b1p = _pad_to(b1.reshape(1, H), (1, Hp)).astype(jnp.float32)
    w2p = _pad_to(w2, (Hp, A)).astype(compute_dtype)
    b2p = b2.reshape(1, A).astype(jnp.float32)
    return w1p, b1p, w2p, b2p


def prepare_linear_params(w, b, compute_dtype=jnp.bfloat16):
    return w.astype(compute_dtype), b.reshape(1, -1).astype(jnp.float32)


# ---------------------------------------------------------------------------
# Tile / core-count selection
# ---------------------------------------------------------------------------
def _num_tensorcores():
    # v7x exposes 2 TensorCores per chip; v5e/v6e have 1.  Best-effort query;
    # fall back to 1 grid step (optimal on the single-TC chips).
    try:
        return max(1, int(getattr(jax.devices()[0], "num_cores", 1) or 1))
    except Exception:
        return 1


def _tiles(batch, num_tiles):
    if num_tiles is None:
        num_tiles = _num_tensorcores()
    num_tiles = max(1, min(num_tiles, batch // 8))
    tm = _round_up(pl.cdiv(batch, num_tiles), 8)
    return num_tiles, tm, tm * num_tiles


# ---------------------------------------------------------------------------
# Wrappers
# ---------------------------------------------------------------------------
def _jnp_hidden(x, w1p, b1p, w2p, b2p):
    h = jnp.maximum(
        jnp.dot(x.astype(w1p.dtype), w1p, preferred_element_type=jnp.float32)
        + b1p, 0.0)
    return jnp.dot(h.astype(w2p.dtype), w2p,
                   preferred_element_type=jnp.float32) + b2p


def _jnp_linear(x, wp, bp):
    return jnp.dot(x.astype(wp.dtype), wp,
                   preferred_element_type=jnp.float32) + bp


def dqn_forward_hidden(x, w1p, b1p, w2p, b2p, num_tiles=None):
    """hidden=True path. Params must come from prepare_hidden_params."""
    B, S = x.shape
    Hp = w1p.shape[1]
    A = w2p.shape[1]

    if B < 8:
        # Acting call (B=1): pure launch overhead in Pallas; let XLA fuse it.
        return _jnp_hidden(x, w1p, b1p, w2p, b2p)

    num_tiles, tm, Bp = _tiles(B, num_tiles)
    xb = x.astype(w1p.dtype)
    if Bp != B:
        xb = jnp.pad(xb, ((0, Bp - B), (0, 0)))

    itemsize = jnp.dtype(w1p.dtype).itemsize
    cost = pl.CostEstimate(
        flops=2 * Bp * (S * Hp + Hp * A),
        transcendentals=0,
        bytes_accessed=(xb.size * itemsize + w1p.size * itemsize
                        + w2p.size * itemsize + b1p.size * 4 + b2p.size * 4
                        + Bp * A * 4))

    out = pl.pallas_call(
        dqn_hidden_kernel,
        out_shape=jax.ShapeDtypeStruct((Bp, A), jnp.float32),
        grid=(num_tiles,),
        in_specs=[
            pl.BlockSpec((tm, S), lambda i: (i, 0)),    # activations (tiled)
            pl.BlockSpec((S, Hp), lambda i: (0, 0)),    # W1: resident
            pl.BlockSpec((1, Hp), lambda i: (0, 0)),    # b1
            pl.BlockSpec((Hp, A), lambda i: (0, 0)),    # W2
            pl.BlockSpec((1, A), lambda i: (0, 0)),     # b2
        ],
        out_specs=pl.BlockSpec((tm, A), lambda i: (i, 0)),
        compiler_params=pltpu.CompilerParams(
            dimension_semantics=("parallel",)),
        cost_estimate=cost,
    )(xb, w1p, b1p, w2p, b2p)
    return out if Bp == B else out[:B]


def dqn_forward_linear(x, wp, bp, num_tiles=None):
    """hidden=False path. Params must come from prepare_linear_params."""
    B, S = x.shape
    A = wp.shape[1]

    if B < 8:
        return _jnp_linear(x, wp, bp)

    num_tiles, tm, Bp = _tiles(B, num_tiles)
    xb = x.astype(wp.dtype)
    if Bp != B:
        xb = jnp.pad(xb, ((0, Bp - B), (0, 0)))

    itemsize = jnp.dtype(wp.dtype).itemsize
    cost = pl.CostEstimate(
        flops=2 * Bp * S * A,
        transcendentals=0,
        bytes_accessed=(xb.size * itemsize + wp.size * itemsize
                        + bp.size * 4 + Bp * A * 4))

    out = pl.pallas_call(
        dqn_linear_kernel,
        out_shape=jax.ShapeDtypeStruct((Bp, A), jnp.float32),
        grid=(num_tiles,),
        in_specs=[
            pl.BlockSpec((tm, S), lambda i: (i, 0)),
            pl.BlockSpec((S, A), lambda i: (0, 0)),
            pl.BlockSpec((1, A), lambda i: (0, 0)),
        ],
        out_specs=pl.BlockSpec((tm, A), lambda i: (i, 0)),
        compiler_params=pltpu.CompilerParams(
            dimension_semantics=("parallel",)),
        cost_estimate=cost,
    )(xb, wp, bp)
    return out if Bp == B else out[:B]


# ---------------------------------------------------------------------------
# Init (mirrors PyTorch nn.Linear default init; stored as [in, out])
# ---------------------------------------------------------------------------
def init_linear(key, in_features, out_features):
    kw, kb = jax.random.split(key)
    bound = 1.0 / jnp.sqrt(jnp.float32(in_features))
    w = jax.random.uniform(kw, (in_features, out_features), jnp.float32,
                           minval=-bound, maxval=bound)
    b = jax.random.uniform(kb, (out_features,), jnp.float32,
                           minval=-bound, maxval=bound)
    return w, b


if __name__ == "__main__":
    key = jax.random.PRNGKey(0)
    k_x, k_l1, k_l2, k_l3 = jax.random.split(key, 4)

    B = 128             # replay-batch sized forward (Pallas path)
    state_dim = 32
    hidden_size = 100   # padded to 128 internally (exact zero padding)
    action_dim = 6      # Taxi-v3 action space; NOT padded on the output side

    x = jax.random.normal(k_x, (B, state_dim), jnp.float32)

    def q16(a):  # bf16 operand quantization used for the tight reference
        return a.astype(jnp.bfloat16).astype(jnp.float32)

    # ----- hidden=True path: Linear -> ReLU -> Linear -----
    w1, b1 = init_linear(k_l1, state_dim, hidden_size)
    w2, b2 = init_linear(k_l2, hidden_size, action_dim)
    w1p, b1p, w2p, b2p = prepare_hidden_params(w1, b1, w2, b2)  # pad/cast once

    q_hidden = jax.block_until_ready(dqn_forward_hidden(x, w1p, b1p, w2p, b2p))
    assert q_hidden.shape == (B, action_dim)

    # Tight check vs. a reference using the same bf16 operand quantization.
    h_ref = jnp.maximum(q16(x) @ q16(w1) + b1, 0.0)
    ref_q16 = q16(h_ref) @ q16(w2) + b2
    assert jnp.allclose(q_hidden, ref_q16, atol=2e-3, rtol=2e-3)
    # Loose check vs. the f32 PyTorch-semantics forward.
    ref_f32 = jnp.maximum(x @ w1 + b1, 0.0) @ w2 + b2
    assert jnp.allclose(q_hidden, ref_f32, atol=1e-1, rtol=1e-1)

    # B=1 acting call takes the XLA fast path but keeps identical semantics.
    q_act = jax.block_until_ready(dqn_forward_hidden(x[:1], w1p, b1p, w2p, b2p))
    assert q_act.shape == (1, action_dim)
    assert jnp.allclose(q_act, ref_q16[:1], atol=2e-3, rtol=2e-3)

    # ----- hidden=False path: single Linear -----
    w, b = init_linear(k_l3, state_dim, action_dim)
    wp, bp = prepare_linear_params(w, b)  # cast once

    q_lin = jax.block_until_ready(dqn_forward_linear(x, wp, bp))
    assert q_lin.shape == (B, action_dim)
    assert jnp.allclose(q_lin, q16(x) @ q16(w) + b, atol=2e-3, rtol=2e-3)
    assert jnp.allclose(q_lin, x @ w + b, atol=1e-1, rtol=1e-1)

    print("KERNEL_OK")
</pallas_src>

<mosaic_0001>
module attributes {stable_mosaic.version = 11 : i64} {
  func.func @dqn_hidden_kernel(%arg0: i32, %arg1: memref<128x32xbf16, #tpu.memory_space<vmem>>, %arg2: memref<32x128xbf16, #tpu.memory_space<vmem>>, %arg3: memref<1x128xf32, #tpu.memory_space<vmem>>, %arg4: memref<128x6xbf16, #tpu.memory_space<vmem>>, %arg5: memref<1x6xf32, #tpu.memory_space<vmem>>, %arg6: memref<128x6xf32, #tpu.memory_space<vmem>>) attributes {dimension_semantics = [#tpu.dimension_semantics<parallel>], iteration_bounds = array<i64: 1>, scalar_prefetch = 0 : i64, scratch_operands = 0 : i64, tpu.core_type = #tpu.core_type<tc>, window_params = [{transform_indices = @transform_0, window_bounds = array<i64: 128, 32>}, {pipeline_mode = #tpu.pipeline_mode<synchronous>, transform_indices = @transform_1, window_bounds = array<i64: 32, 128>}, {pipeline_mode = #tpu.pipeline_mode<synchronous>, transform_indices = @transform_2, window_bounds = array<i64: 1, 128>}, {pipeline_mode = #tpu.pipeline_mode<synchronous>, transform_indices = @transform_3, window_bounds = array<i64: 128, 6>}, {pipeline_mode = #tpu.pipeline_mode<synchronous>, transform_indices = @transform_4, window_bounds = array<i64: 1, 6>}, {transform_indices = @transform_5, window_bounds = array<i64: 128, 6>}]} {
    %c0 = arith.constant 0 : index
    %c0_0 = arith.constant 0 : index
    %0 = vector.load %arg1[%c0, %c0_0] : memref<128x32xbf16, #tpu.memory_space<vmem>>, vector<128x32xbf16>
    %c0_1 = arith.constant 0 : index
    %c0_2 = arith.constant 0 : index
    %1 = vector.load %arg2[%c0_1, %c0_2] : memref<32x128xbf16, #tpu.memory_space<vmem>>, vector<32x128xbf16>
    %cst = arith.constant dense<0.000000e+00> : vector<128x128xf32>
    %2 = tpu.matmul %0, %1, %cst {dimension_numbers = #tpu.dot_dimension_numbers<[1], [0], [0], [1], [0, 0, 1, 1], [], []>} : vector<128x32xbf16>, vector<32x128xbf16>, vector<128x128xf32> -> vector<128x128xf32>
    %c0_3 = arith.constant 0 : index
    %c0_4 = arith.constant 0 : index
    %3 = vector.load %arg3[%c0_3, %c0_4] : memref<1x128xf32, #tpu.memory_space<vmem>>, vector<1x128xf32>
    %4 = vector.broadcast %3 : vector<1x128xf32> to vector<128x128xf32>
    %5 = arith.addf %2, %4 : vector<128x128xf32>
    %cst_5 = arith.constant 0.000000e+00 : f32
    %6 = vector.broadcast %cst_5 : f32 to vector<128x128xf32>
    %7 = arith.maximumf %5, %6 : vector<128x128xf32>
    %8 = arith.truncf %7 : vector<128x128xf32> to vector<128x128xbf16>
    %c0_6 = arith.constant 0 : index
    %c0_7 = arith.constant 0 : index
    %9 = vector.load %arg4[%c0_6, %c0_7] : memref<128x6xbf16, #tpu.memory_space<vmem>>, vector<128x6xbf16>
    %cst_8 = arith.constant dense<0.000000e+00> : vector<128x6xf32>
    %10 = tpu.matmul %8, %9, %cst_8 {dimension_numbers = #tpu.dot_dimension_numbers<[1], [0], [0], [1], [0, 0, 1, 1], [], []>} : vector<128x128xbf16>, vector<128x6xbf16>, vector<128x6xf32> -> vector<128x6xf32>
    %c0_9 = arith.constant 0 : index
    %c0_10 = arith.constant 0 : index
    %11 = vector.load %arg5[%c0_9, %c0_10] : memref<1x6xf32, #tpu.memory_space<vmem>>, vector<1x6xf32>
    %12 = vector.broadcast %11 : vector<1x6xf32> to vector<128x6xf32>
    %13 = arith.addf %10, %12 : vector<128x6xf32>
    %c0_11 = arith.constant 0 : index
    %c0_12 = arith.constant 0 : index
    %14 = vector.load %arg6[%c0_11, %c0_12] : memref<128x6xf32, #tpu.memory_space<vmem>>, vector<128x6xf32>
    tpu.vector_store %arg6[%c0_11, %c0_12], %13 {strides = array<i32>} : memref<128x6xf32, #tpu.memory_space<vmem>>, vector<128x6xf32>,
    return
  }
  func.func @transform_0(%arg0: i32) -> (i32, i32) {
    %c0_i32 = arith.constant 0 : i32
    %c0_i32_0 = arith.constant 0 : i32
    return %arg0, %c0_i32 : i32, i32
  }
  func.func @transform_1(%arg0: i32) -> (i32, i32) {
    %c0_i32 = arith.constant 0 : i32
    %c0_i32_0 = arith.constant 0 : i32
    %c0_i32_1 = arith.constant 0 : i32
    return %c0_i32, %c0_i32_0 : i32, i32
  }
  func.func @transform_2(%arg0: i32) -> (i32, i32) {
    %c0_i32 = arith.constant 0 : i32
    %c0_i32_0 = arith.constant 0 : i32
    %c0_i32_1 = arith.constant 0 : i32
    return %c0_i32, %c0_i32_0 : i32, i32
  }
  func.func @transform_3(%arg0: i32) -> (i32, i32) {
    %c0_i32 = arith.constant 0 : i32
    %c0_i32_0 = arith.constant 0 : i32
    %c0_i32_1 = arith.constant 0 : i32
    return %c0_i32, %c0_i32_0 : i32, i32
  }
  func.func @transform_4(%arg0: i32) -> (i32, i32) {
    %c0_i32 = arith.constant 0 : i32
    %c0_i32_0 = arith.constant 0 : i32
    %c0_i32_1 = arith.constant 0 : i32
    return %c0_i32, %c0_i32_0 : i32, i32
  }
  func.func @transform_5(%arg0: i32) -> (i32, i32) {
    %c0_i32 = arith.constant 0 : i32
    %c0_i32_0 = arith.constant 0 : i32
    return %arg0, %c0_i32 : i32, i32
  }
}

</mosaic_0001>

<bundles_post_ra>
// kernel: tpu_custom_call.1
= control target key start
LH: loop header
LB: loop body
LE: loop exit
PB: predicated region body
PF: predicated region fallthrough
CT: control target
= control target key end

     0   :  { %vm97_vm0 = vcmask 261120   ;;  %vm312_vm1 = vcmask 48128   ;;  %s605_s1 = inlined_call_operand.vmem [shape: bf16[32,128], index: 1, kind: input, shape index: {}]   ;;  %s606_s2 = inlined_call_operand.vmem [shape: f32[1,128], index: 2, kind: input, shape index: {}]   ;;  %s607_s0 = inlined_call_operand.vmem [shape: bf16[128,32], index: 0, kind: input, shape index: {}]   ;;  %s608_s3 = inlined_call_operand.vmem [shape: bf16[128,6], index: 3, kind: input, shape index: {}]   ;;  %s609_s4 = inlined_call_operand.vmem [shape: f32[1,6], index: 4, kind: input, shape index: {}]   ;;  %s610_s5 = inlined_call_operand.vmem [shape: f32[128,6], index: 5, kind: output, shape index: {}]  }
   0x1   :  { %v422_v0 = vld [vmem:[%s605_s1 + $0x8] sm:$0xff]  ;;  %v421_v1 = vld [vmem:[%s605_s1] sm:$0xff]  ;;  %v415_v4 = vld [vmem:[%s607_s0 + $0x10] sm:$0xff] }
   0x2   :  { %128 = vmatpush.bf16.msra.mxu0 %v422_v0  ;;  %431 = vmatpush.bf16.msra.mxu3 %v422_v0  ;;  %v413_v2 = vld [vmem:[%s607_s0] sm:$0xff]  ;;  %v414_v3 = vld [vmem:[%s607_s0 + $0x8] sm:$0xff]  ;;  %v430_v6 = vld [vmem:[%s608_s3 + $0x38] sm:$0xff] }
   0x3   :  { %v418_v5 = vld [vmem:[%s607_s0 + $0x28] sm:$0xff]  ;;  %263 = vmatpush.bf16.msra.mxu1 %v430_v6  ;;  %v429_v7 = vld [vmem:[%s608_s3 + $0x30] sm:$0xff]  ;;  %433 = vmatpush.bf16.msra.mxu2 %v430_v6  ;;  %v416_v9 = vld [vmem:[%s607_s0 + $0x18] sm:$0xff] }
   0x4   :  { %v428_v8 = vld [vmem:[%s608_s3 + $0x28] sm:$0xff]  ;;  %v427_v10 = vld [vmem:[%s608_s3 + $0x20] sm:$0xff]  ;;  %v419_v11 = vld [vmem:[%s607_s0 + $0x30] sm:$0xff] }
   0x5   :  { %v417_v12 = vld [vmem:[%s607_s0 + $0x20] sm:$0xff]  ;;  %v420_v13 = vld [vmem:[%s607_s0 + $0x38] sm:$0xff]  ;;  %v425_v15 = vld [vmem:[%s608_s3 + $0x10] sm:$0xff] }
   0x6   :  { %129 = vmatpush.bf16.msra.mxu0 %v421_v1  ;;  %432 = vmatpush.bf16.msra.mxu3 %v421_v1  ;;  %v426_v14 = vld [vmem:[%s608_s3 + $0x18] sm:$0xff]  ;;  %v424_v16 = vld [vmem:[%s608_s3 + $0x8] sm:$0xff]  ;;  %v423_v17 = vld [vmem:[%s608_s3] sm:$0xff] }
   0x7   :  { %264 = vmatpush.bf16.msra.mxu1 %v429_v7  ;;  %434 = vmatpush.bf16.msra.mxu2 %v429_v7  ;;  %v441_v19 = vld [vmem:[%s606_s2] ss:$0 sm:$0xff] }
   0x9   :  { %373 = vmatmul.msk.bf16.vlgmr.msra.gmra.mxu0 %vm97_vm0, %v413_v2  ;;  %378 = vmatmul.msk.bf16.vlgmr.msra.gmra.mxu3 %vm97_vm0, %v418_v5 }
   0xb   :  { %265 = vmatpush.bf16.msra.mxu1 %v428_v8  ;;  %435 = vmatpush.bf16.msra.mxu2 %v428_v8 }
   0xf   :  { %266 = vmatpush.bf16.msra.mxu1 %v427_v10  ;;  %436 = vmatpush.bf16.msra.mxu2 %v427_v10 }
  0x13   :  { %267 = vmatpush.bf16.msra.mxu1 %v426_v14  ;;  %437 = vmatpush.bf16.msra.mxu2 %v426_v14 }
  0x17   :  { %268 = vmatpush.bf16.msra.mxu1 %v425_v15  ;;  %438 = vmatpush.bf16.msra.mxu2 %v425_v15 }
  0x19   :  { %374 = vmatmul.msk.bf16.gmra.mxu0 %vm97_vm0, %v414_v3  ;;  %379 = vmatmul.msk.bf16.gmra.mxu3 %vm97_vm0, %v419_v11  ;;  %v442_v11 = vld [vmem:[%s609_s4] ss:$0 sm:$0xff] }
  0x1b   :  { %269 = vmatpush.bf16.msra.mxu1 %v424_v16  ;;  %439 = vmatpush.bf16.msra.mxu2 %v424_v16 }
  0x1f   :  { %270 = vmatpush.bf16.msra.mxu1 %v423_v17  ;;  %440 = vmatpush.bf16.msra.mxu2 %v423_v17 }
  0x29   :  { %375 = vmatmul.msk.bf16.gmra.mxu0 %vm97_vm0, %v415_v4  ;;  %380 = vmatmul.msk.bf16.gmra.mxu3 %vm97_vm0, %v420_v13 }
  0x39   :  { %376 = vmatmul.msk.bf16.gmra.mxu0 %vm97_vm0, %v416_v9 }
  0x49   :  { %377 = vmatmul.msk.bf16.gmra.mxu0 %vm97_vm0, %v417_v12 }
  0x86   :  { %v131_v18 = vpop.f32.mrf.mxu0 }
  0x87   :  { %v132_v20 = vadd.f32 %v441_v19, %v131_v18 }
  0x89   :  { %v171_v23 = vmax.f32 %v132_v20, 0.0 }
  0x8c   :  { %v156_v48 = vpop.f32.mrf.mxu3 }
  0x8d   :  { %v157_v57 = vadd.f32 %v441_v19, %v156_v48 }
  0x8e   :  { %v133_v21 = vpop.f32.mrf.mxu0 }
  0x8f   :  { %v134_v22 = vadd.f32 %v441_v19, %v133_v21  ;;  %v181_v59 = vmax.f32 %v157_v57, 0.0 }
  0x91   :  { %v172_v24 = vmax.f32 %v134_v22, 0.0 }
  0x93   :  { %v187_v25 = vpack.c.bf16 %v172_v24, %v171_v23 }
  0x94   :  { %v158_v52 = vpop.f32.mrf.mxu3 }
  0x95   :  { %271 = vmatmul.bf16.vlgmr.msra.gmra.mxu1 %v187_v25  ;;  %v159_v58 = vadd.f32 %v441_v19, %v158_v52 }
  0x96   :  { %v136_v26 = vpop.f32.mrf.mxu0 }
  0x97   :  { %v137_v27 = vadd.f32 %v441_v19, %v136_v26  ;;  %v182_v60 = vmax.f32 %v159_v58, 0.0 }
  0x99   :  { %v173_v30 = vmax.f32 %v137_v27, 0.0  ;;  %v192_v61 = vpack.c.bf16 %v182_v60, %v181_v59 }
  0x9c   :  { %v161_v56 = vpop.f32.mrf.mxu3 }
  0x9d   :  { %v162_v63 = vadd.f32 %v441_v19, %v161_v56 }
  0x9e   :  { %v138_v28 = vpop.f32.mrf.mxu0 }
  0x9f   :  { %v139_v29 = vadd.f32 %v441_v19, %v138_v28  ;;  %v183_v2 = vmax.f32 %v162_v63, 0.0 }
  0xa1   :  { %v174_v31 = vmax.f32 %v139_v29, 0.0 }
  0xa3   :  { %v188_v32 = vpack.c.bf16 %v174_v31, %v173_v30 }
  0xa4   :  { %v163_v62 = vpop.f32.mrf.mxu3 }
  0xa5   :  { %276 = vmatmul.bf16.gmra.mxu1 %v188_v32  ;;  %v164_v0 = vadd.f32 %v441_v19, %v163_v62 }
  0xa6   :  { %v141_v33 = vpop.f32.mrf.mxu0 }
  0xa7   :  { %v142_v34 = vadd.f32 %v441_v19, %v141_v33  ;;  %v184_v3 = vmax.f32 %v164_v0, 0.0 }
  0xa9   :  { %v175_v37 = vmax.f32 %v142_v34, 0.0  ;;  %v193_v4 = vpack.c.bf16 %v184_v3, %v183_v2 }
  0xac   :  { %v166_v1 = vpop.f32.mrf.mxu3 }
  0xad   :  { %v167_v6 = vadd.f32 %v441_v19, %v166_v1 }
  0xae   :  { %v143_v35 = vpop.f32.mrf.mxu0 }
  0xaf   :  { %v144_v36 = vadd.f32 %v441_v19, %v143_v35  ;;  %v185_v8 = vmax.f32 %v167_v6, 0.0 }
  0xb1   :  { %v176_v38 = vmax.f32 %v144_v36, 0.0 }
  0xb3   :  { %v189_v39 = vpack.c.bf16 %v176_v38, %v175_v37 }
  0xb4   :  { %v168_v5 = vpop.f32.mrf.mxu3 }
  0xb5   :  { %281 = vmatmul.bf16.gmra.mxu1 %v189_v39  ;;  %v169_v7 = vadd.f32 %v441_v19, %v168_v5 }
  0xb6   :  { %v146_v40 = vpop.f32.mrf.mxu0 }
  0xb7   :  { %v147_v41 = vadd.f32 %v441_v19, %v146_v40  ;;  %v186_v9 = vmax.f32 %v169_v7, 0.0 }
  0xb9   :  { %v177_v44 = vmax.f32 %v147_v41, 0.0  ;;  %v194_v10 = vpack.c.bf16 %v186_v9, %v185_v8 }
  0xbe   :  { %v148_v42 = vpop.f32.mrf.mxu0 }
  0xbf   :  { %v149_v43 = vadd.f32 %v441_v19, %v148_v42 }
  0xc1   :  { %v178_v45 = vmax.f32 %v149_v43, 0.0 }
  0xc3   :  { %v190_v46 = vpack.c.bf16 %v178_v45, %v177_v44 }
  0xc5   :  { %286 = vmatmul.bf16.gmra.mxu1 %v190_v46 }
  0xc6   :  { %v151_v47 = vpop.f32.mrf.mxu0 }
  0xc7   :  { %v152_v49 = vadd.f32 %v441_v19, %v151_v47 }
  0xc9   :  { %v179_v53 = vmax.f32 %v152_v49, 0.0 }
  0xce   :  { %v153_v50 = vpop.f32.mrf.mxu0 }
  0xcf   :  { %v154_v51 = vadd.f32 %v441_v19, %v153_v50 }
  0xd1   :  { %v180_v54 = vmax.f32 %v154_v51, 0.0 }
  0xd3   :  { %v191_v55 = vpack.c.bf16 %v180_v54, %v179_v53 }
  0xd5   :  { %291 = vmatmul.bf16.vlgmr.msra.gmra.mxu2 %v191_v55 }
  0xe5   :  { %296 = vmatmul.bf16.gmra.mxu2 %v192_v61 }
  0xf5   :  { %301 = vmatmul.bf16.gmra.mxu2 %v193_v4 }
 0x105   :  { %306 = vmatmul.bf16.gmra.mxu2 %v194_v10 }
 0x112   :  { %v272_v12 = vpop.f32.mrf.mxu1 }
 0x113   :  { %v273_v13 = vadd.f32 %v442_v11, %v272_v12 }
 0x115   :  { %313 = vst.msk [vmem:[%s610_s5] sm:$0xff] %vm312_vm1, %v273_v13 }
 0x11a   :  { %v274_v14 = vpop.f32.mrf.mxu1 }
 0x11b   :  { %v275_v15 = vadd.f32 %v442_v11, %v274_v14 }
 0x11d   :  { %314 = vst.msk [vmem:[%s610_s5 + $0x8] sm:$0xff] %vm312_vm1, %v275_v15 }
 0x122   :  { %v277_v16 = vpop.f32.mrf.mxu1 }
 0x123   :  { %v278_v17 = vadd.f32 %v442_v11, %v277_v16 }
 0x125   :  { %315 = vst.msk [vmem:[%s610_s5 + $0x10] sm:$0xff] %vm312_vm1, %v278_v17 }
 0x12a   :  { %v279_v18 = vpop.f32.mrf.mxu1 }
 0x12b   :  { %v280_v19 = vadd.f32 %v442_v11, %v279_v18 }
 0x12d   :  { %316 = vst.msk [vmem:[%s610_s5 + $0x18] sm:$0xff] %vm312_vm1, %v280_v19 }
 0x132   :  { %v282_v20 = vpop.f32.mrf.mxu1 }
 0x133   :  { %v283_v21 = vadd.f32 %v442_v11, %v282_v20 }
 0x135   :  { %317 = vst.msk [vmem:[%s610_s5 + $0x20] sm:$0xff] %vm312_vm1, %v283_v21 }
 0x13a   :  { %v284_v22 = vpop.f32.mrf.mxu1 }
 0x13b   :  { %v285_v23 = vadd.f32 %v442_v11, %v284_v22 }
 0x13d   :  { %318 = vst.msk [vmem:[%s610_s5 + $0x28] sm:$0xff] %vm312_vm1, %v285_v23 }
 0x142   :  { %v287_v24 = vpop.f32.mrf.mxu1 }
 0x143   :  { %v288_v25 = vadd.f32 %v442_v11, %v287_v24 }
 0x145   :  { %319 = vst.msk [vmem:[%s610_s5 + $0x30] sm:$0xff] %vm312_vm1, %v288_v25 }
 0x14a   :  { %v289_v26 = vpop.f32.mrf.mxu1 }
 0x14b   :  { %v290_v27 = vadd.f32 %v442_v11, %v289_v26 }
 0x14d   :  { %320 = vst.msk [vmem:[%s610_s5 + $0x38] sm:$0xff] %vm312_vm1, %v290_v27 }
 0x158   :  { %v292_v28 = vpop.f32.mrf.mxu2 }
 0x159   :  { %v293_v29 = vadd.f32 %v442_v11, %v292_v28 }
 0x15b   :  { %321 = vst.msk [vmem:[%s610_s5 + $0x40] sm:$0xff] %vm312_vm1, %v293_v29 }
 0x160   :  { %v294_v30 = vpop.f32.mrf.mxu2 }
 0x161   :  { %v295_v31 = vadd.f32 %v442_v11, %v294_v30 }
 0x163   :  { %322 = vst.msk [vmem:[%s610_s5 + $0x48] sm:$0xff] %vm312_vm1, %v295_v31 }
 0x168   :  { %v297_v32 = vpop.f32.mrf.mxu2 }
 0x169   :  { %v298_v33 = vadd.f32 %v442_v11, %v297_v32 }
 0x16b   :  { %323 = vst.msk [vmem:[%s610_s5 + $0x50] sm:$0xff] %vm312_vm1, %v298_v33 }
 0x170   :  { %v299_v34 = vpop.f32.mrf.mxu2 }
 0x171   :  { %v300_v35 = vadd.f32 %v442_v11, %v299_v34 }
 0x173   :  { %324 = vst.msk [vmem:[%s610_s5 + $0x58] sm:$0xff] %vm312_vm1, %v300_v35 }
 0x178   :  { %v302_v36 = vpop.f32.mrf.mxu2 }
 0x179   :  { %v303_v37 = vadd.f32 %v442_v11, %v302_v36 }
 0x17b   :  { %325 = vst.msk [vmem:[%s610_s5 + $0x60] sm:$0xff] %vm312_vm1, %v303_v37 }
 0x180   :  { %v304_v38 = vpop.f32.mrf.mxu2 }
 0x181   :  { %v305_v39 = vadd.f32 %v442_v11, %v304_v38 }
 0x183   :  { %326 = vst.msk [vmem:[%s610_s5 + $0x68] sm:$0xff] %vm312_vm1, %v305_v39 }
 0x188   :  { %v307_v40 = vpop.f32.mrf.mxu2 }
 0x189   :  { %v308_v41 = vadd.f32 %v442_v11, %v307_v40 }
 0x18b   :  { %327 = vst.msk [vmem:[%s610_s5 + $0x70] sm:$0xff] %vm312_vm1, %v308_v41 }
 0x190   :  { %v309_v42 = vpop.f32.mrf.mxu2 }
 0x191   :  { %v310_v43 = vadd.f32 %v442_v11, %v309_v42 }
 0x193   :  { %328 = vst.msk [vmem:[%s610_s5 + $0x78] sm:$0xff] %vm312_vm1, %v310_v43 }

</bundles_post_ra>
